<compile_context>
chip_gen: v7x
topology: tpu7x:2x2x1
jax: 0.10.0
libtpu: 0.0.40
codegen_flags: <defaults>
</compile_context>

<pallas_src>
import functools

import jax
import jax.numpy as jnp
from jax.experimental import pallas as pl
from jax.experimental.pallas import tpu as pltpu


def _round_up(x, m):
    return ((x + m - 1) // m) * m


def _pick_tile(hw, per_pixel_bytes, target_bytes=2 << 20, max_tile=8192):
    """Pixel tile: ~target_bytes of per-step traffic, multiple of 128 lanes."""
    tile = (target_bytes // per_pixel_bytes) // 128 * 128
    tile = int(min(max(tile, 128), max_tile))
    if hw <= tile:
        return hw                      # block == full axis is always legal
    return tile


def _rpn_head_kernel(x_ref, w_ref, b_ref, logits_ref, bbox_ref, *,
                     num_anchors, bbox_rows, use_mxu):
    """Fused 1x1-conv kernel for one (image, pixel-tile) grid step.

    x_ref      : (C, T)        pixel tile (pixels on lanes)
    w_ref      : (out_pad, C)  fused [bbox ; pad ; cls ; pad] weight
    b_ref      : (out_pad, 1)  fused bias (f32)
    logits_ref : (A, T)
    bbox_ref   : (4A, T)
    """
    a = num_anchors
    x = x_ref[...]
    w = w_ref[...]
    if use_mxu:
        acc = jnp.dot(w, x, preferred_element_type=jnp.float32)
    else:
        # Small-C path: a handful of unrolled VPU broadcast-FMAs is cheaper
        # than an MXU push/pop when K (=C) is far below the systolic dim.
        cin = w.shape[1]
        xf = x.astype(jnp.float32)
        wf = w.astype(jnp.float32)
        acc = wf[:, 0:1] * xf[0:1, :]
        for k in range(1, cin):
            acc = acc + wf[:, k:k + 1] * xf[k:k + 1, :]
    acc = acc + b_ref[...]                      # lane-broadcast bias (f32)
    # bbox rows start at sublane 0 (large, unshifted store); cls rows start at
    # bbox_rows (a multiple of 8), so that slice is sublane-aligned.
    bbox_ref[...] = acc[:4 * a].astype(bbox_ref.dtype)
    logits_ref[...] = acc[bbox_rows:bbox_rows + a].astype(logits_ref.dtype)


@functools.partial(jax.jit, static_argnames=("num_anchors",))
def _rpn_head_single(x_nchw, w_cat, b_cat, *, num_anchors):
    """Apply the fused cls/bbox 1x1 convs to one NCHW feature map."""
    n, c, h, w = x_nchw.shape
    a = num_anchors
    a4 = 4 * a
    bbox_rows = _round_up(a4, 8)
    out_pad = w_cat.shape[0]
    dtype = x_nchw.dtype
    itemsize = jnp.dtype(dtype).itemsize

    hw = h * w
    x = x_nchw.reshape(n, c, hw)        # free reshape, stays in NCHW order

    # Weights travel in the activation dtype (bf16 stays bf16 -> halves the
    # dominant HBM read); bias stays f32 and feeds the f32 accumulator.
    w_k = w_cat.astype(dtype)
    b_k = b_cat.astype(jnp.float32)

    # Byte-based tile sizing (read + both writes per pixel).  A partial
    # trailing tile is fine: OOB input lanes only feed OOB output lanes,
    # which Pallas drops (no reduction across the pixel axis).
    per_pixel_bytes = (c + a + a4) * itemsize
    tile = _pick_tile(hw, per_pixel_bytes)
    grid = (n, pl.cdiv(hw, tile))

    use_mxu = c > 32
    kernel = functools.partial(_rpn_head_kernel, num_anchors=a,
                               bbox_rows=bbox_rows, use_mxu=use_mxu)

    cost = pl.CostEstimate(
        flops=2 * c * out_pad * n * hw,
        transcendentals=0,
        bytes_accessed=itemsize * n * hw * (c + a + a4)
        + itemsize * out_pad * (c + 1),
    )

    logits, bbox = pl.pallas_call(
        kernel,
        out_shape=(
            jax.ShapeDtypeStruct((n, a, hw), dtype),
            jax.ShapeDtypeStruct((n, a4, hw), dtype),
        ),
        grid_spec=pltpu.PrefetchScalarGridSpec(
            num_scalar_prefetch=0,
            grid=grid,
            in_specs=[
                pl.BlockSpec((None, c, tile), lambda i, j: (i, 0, j)),   # x
                pl.BlockSpec((out_pad, c), lambda i, j: (0, 0)),         # W_cat
                pl.BlockSpec((out_pad, 1), lambda i, j: (0, 0)),         # b_cat
            ],
            out_specs=[
                pl.BlockSpec((None, a, tile), lambda i, j: (i, 0, j)),
                pl.BlockSpec((None, a4, tile), lambda i, j: (i, 0, j)),
            ],
        ),
        compiler_params=pltpu.CompilerParams(
            dimension_semantics=("parallel", "parallel"),
            vmem_limit_bytes=32 * 1024 * 1024),
        cost_estimate=cost,
    )(x, w_k, b_k)

    # (N, out, H*W) -> (N, out, H, W): free reshape, already NCHW.
    return logits.reshape(n, a, h, w), bbox.reshape(n, a4, h, w)


class RPNHeadConvRegressorPallas:
    """JAX/Pallas re-implementation of maskrcnn_benchmark RPNHeadConvRegressor."""

    def __init__(self, in_channels, num_anchors, key):
        kc, kb = jax.random.split(key)
        a = num_anchors
        self.num_anchors = a
        # PyTorch conv weights are (out, in, 1, 1); keep (out, in) here.
        # init: normal(std=0.01) weights, zero biases — same as the module.
        self.w_cls = 0.01 * jax.random.normal(kc, (a, in_channels), jnp.float32)
        self.b_cls = jnp.zeros((a,), jnp.float32)
        self.w_bbox = 0.01 * jax.random.normal(
            kb, (4 * a, in_channels), jnp.float32)
        self.b_bbox = jnp.zeros((4 * a,), jnp.float32)

        # Fused, sublane-padded weight/bias, bbox rows FIRST: bbox at [0, 4A),
        # cls at [round_up(4A,8), round_up(4A,8)+A).  The big store then begins
        # at sublane 0 and the small cls slice is sublane-aligned.
        bbox_rows = _round_up(4 * a, 8)
        out_pad = bbox_rows + _round_up(a, 8)
        w_cat = jnp.zeros((out_pad, in_channels), jnp.float32)
        w_cat = w_cat.at[:4 * a].set(self.w_bbox)
        w_cat = w_cat.at[bbox_rows:bbox_rows + a].set(self.w_cls)
        b_cat = jnp.zeros((out_pad, 1), jnp.float32)
        b_cat = b_cat.at[:4 * a, 0].set(self.b_bbox)
        b_cat = b_cat.at[bbox_rows:bbox_rows + a, 0].set(self.b_cls)
        self.w_cat = w_cat
        self.b_cat = b_cat

    def __call__(self, x):
        assert isinstance(x, (list, tuple))
        # TODO(synk): batch all FPN levels into one pallas_call (manual HBM
        # DMA + scalar-prefetched per-level offsets) to amortise launch /
        # weight-DMA overhead on tiny levels and keep both v7x TensorCores
        # busy; kept one call per level (N x tiles grid, both "parallel").
        logits, bbox_reg = [], []
        for y in x:
            lg, bb = _rpn_head_single(y, self.w_cat, self.b_cat,
                                      num_anchors=self.num_anchors)
            logits.append(lg)
            bbox_reg.append(bb)
        return logits, bbox_reg


if __name__ == "__main__":
    key = jax.random.PRNGKey(0)
    k_param, k_x0, k_x1 = jax.random.split(key, 3)

    in_channels = 4
    num_anchors = 3

    head = RPNHeadConvRegressorPallas(in_channels, num_anchors, k_param)

    # A small FPN-like list of two feature maps, NCHW.
    x0 = jax.random.normal(k_x0, (2, in_channels, 16, 16), dtype=jnp.float32)
    x1 = jax.random.normal(k_x1, (2, in_channels, 8, 8), dtype=jnp.float32)
    feats = [x0, x1]

    logits, bbox_reg = head(feats)
    jax.block_until_ready(logits)
    jax.block_until_ready(bbox_reg)

    # Sanity check against a plain-JAX reference (1x1 conv == channel matmul).
    for y, lg, bb in zip(feats, logits, bbox_reg):
        ref_lg = (jnp.einsum("nchw,ac->nahw", y, head.w_cls)
                  + head.b_cls[None, :, None, None])
        ref_bb = (jnp.einsum("nchw,ac->nahw", y, head.w_bbox)
                  + head.b_bbox[None, :, None, None])
        assert lg.shape == (y.shape[0], num_anchors, y.shape[2], y.shape[3])
        assert bb.shape == (y.shape[0], 4 * num_anchors, y.shape[2], y.shape[3])
        assert jnp.allclose(lg, ref_lg, atol=1e-5, rtol=1e-5)
        assert jnp.allclose(bb, ref_bb, atol=1e-5, rtol=1e-5)

    # bf16 smoke test: activation dtype is preserved end-to-end (no f32 upcast
    # of x in the wrapper), accumulation stays f32 inside the kernel.
    feats_bf16 = [y.astype(jnp.bfloat16) for y in feats]
    lg16, bb16 = head(feats_bf16)
    jax.block_until_ready(lg16)
    jax.block_until_ready(bb16)
    assert lg16[0].dtype == jnp.bfloat16 and bb16[0].dtype == jnp.bfloat16
    assert lg16[0].shape == logits[0].shape and bb16[0].shape == bbox_reg[0].shape

    print("KERNEL_OK")
</pallas_src>

<mosaic_0001>
module attributes {stable_mosaic.version = 11 : i64} {
  func.func @_rpn_head_kernel(%arg0: i32, %arg1: i32, %arg2: memref<1x4x256xf32, #tpu.memory_space<vmem>>, %arg3: memref<24x4xf32, #tpu.memory_space<vmem>>, %arg4: memref<24x1xf32, #tpu.memory_space<vmem>>, %arg5: memref<1x3x256xf32, #tpu.memory_space<vmem>>, %arg6: memref<1x12x256xf32, #tpu.memory_space<vmem>>) attributes {dimension_semantics = [#tpu.dimension_semantics<parallel>, #tpu.dimension_semantics<parallel>], iteration_bounds = array<i64: 2, 1>, scalar_prefetch = 0 : i64, scratch_operands = 0 : i64, tpu.core_type = #tpu.core_type<tc>, window_params = [{transform_indices = @transform_0, window_bounds = array<i64: 1, 4, 256>}, {pipeline_mode = #tpu.pipeline_mode<synchronous>, transform_indices = @transform_1, window_bounds = array<i64: 24, 4>}, {pipeline_mode = #tpu.pipeline_mode<synchronous>, transform_indices = @transform_2, window_bounds = array<i64: 24, 1>}, {transform_indices = @transform_3, window_bounds = array<i64: 1, 3, 256>}, {transform_indices = @transform_4, window_bounds = array<i64: 1, 12, 256>}]} {
    %c0 = arith.constant 0 : index
    %c0_0 = arith.constant 0 : index
    %c0_1 = arith.constant 0 : index
    %0 = vector.load %arg2[%c0, %c0_0, %c0_1] : memref<1x4x256xf32, #tpu.memory_space<vmem>>, vector<1x4x256xf32>
    %1 = vector.shape_cast %0 : vector<1x4x256xf32> to vector<4x256xf32>
    %c0_2 = arith.constant 0 : index
    %c0_3 = arith.constant 0 : index
    %2 = vector.load %arg3[%c0_2, %c0_3] : memref<24x4xf32, #tpu.memory_space<vmem>>, vector<24x4xf32>
    %3 = vector.extract_strided_slice %2 {offsets = [0, 0], sizes = [24, 1], strides = [1, 1]} : vector<24x4xf32> to vector<24x1xf32>
    %4 = vector.extract_strided_slice %1 {offsets = [0, 0], sizes = [1, 256], strides = [1, 1]} : vector<4x256xf32> to vector<1x256xf32>
    %5 = vector.broadcast %3 : vector<24x1xf32> to vector<24x256xf32>
    %6 = vector.broadcast %4 : vector<1x256xf32> to vector<24x256xf32>
    %7 = arith.mulf %5, %6 : vector<24x256xf32>
    %8 = vector.extract_strided_slice %2 {offsets = [0, 1], sizes = [24, 1], strides = [1, 1]} : vector<24x4xf32> to vector<24x1xf32>
    %9 = vector.extract_strided_slice %1 {offsets = [1, 0], sizes = [1, 256], strides = [1, 1]} : vector<4x256xf32> to vector<1x256xf32>
    %10 = vector.broadcast %8 : vector<24x1xf32> to vector<24x256xf32>
    %11 = vector.broadcast %9 : vector<1x256xf32> to vector<24x256xf32>
    %12 = arith.mulf %10, %11 : vector<24x256xf32>
    %13 = arith.addf %7, %12 : vector<24x256xf32>
    %14 = vector.extract_strided_slice %2 {offsets = [0, 2], sizes = [24, 1], strides = [1, 1]} : vector<24x4xf32> to vector<24x1xf32>
    %15 = vector.extract_strided_slice %1 {offsets = [2, 0], sizes = [1, 256], strides = [1, 1]} : vector<4x256xf32> to vector<1x256xf32>
    %16 = vector.broadcast %14 : vector<24x1xf32> to vector<24x256xf32>
    %17 = vector.broadcast %15 : vector<1x256xf32> to vector<24x256xf32>
    %18 = arith.mulf %16, %17 : vector<24x256xf32>
    %19 = arith.addf %13, %18 : vector<24x256xf32>
    %20 = vector.extract_strided_slice %2 {offsets = [0, 3], sizes = [24, 1], strides = [1, 1]} : vector<24x4xf32> to vector<24x1xf32>
    %21 = vector.extract_strided_slice %1 {offsets = [3, 0], sizes = [1, 256], strides = [1, 1]} : vector<4x256xf32> to vector<1x256xf32>
    %22 = vector.broadcast %20 : vector<24x1xf32> to vector<24x256xf32>
    %23 = vector.broadcast %21 : vector<1x256xf32> to vector<24x256xf32>
    %24 = arith.mulf %22, %23 : vector<24x256xf32>
    %25 = arith.addf %19, %24 : vector<24x256xf32>
    %c0_4 = arith.constant 0 : index
    %c0_5 = arith.constant 0 : index
    %26 = vector.load %arg4[%c0_4, %c0_5] : memref<24x1xf32, #tpu.memory_space<vmem>>, vector<24x1xf32>
    %27 = vector.broadcast %26 : vector<24x1xf32> to vector<24x256xf32>
    %28 = arith.addf %25, %27 : vector<24x256xf32>
    %29 = vector.extract_strided_slice %28 {offsets = [0, 0], sizes = [12, 256], strides = [1, 1]} : vector<24x256xf32> to vector<12x256xf32>
    %c0_6 = arith.constant 0 : index
    %c0_7 = arith.constant 0 : index
    %c0_8 = arith.constant 0 : index
    %30 = vector.load %arg6[%c0_6, %c0_7, %c0_8] : memref<1x12x256xf32, #tpu.memory_space<vmem>>, vector<1x12x256xf32>
    %31 = vector.shape_cast %30 : vector<1x12x256xf32> to vector<12x256xf32>
    %32 = vector.shape_cast %29 : vector<12x256xf32> to vector<1x12x256xf32>
    tpu.vector_store %arg6[%c0_6, %c0_7, %c0_8], %32 {strides = array<i32>} : memref<1x12x256xf32, #tpu.memory_space<vmem>>, vector<1x12x256xf32>,
    %33 = vector.extract_strided_slice %28 {offsets = [16, 0], sizes = [3, 256], strides = [1, 1]} : vector<24x256xf32> to vector<3x256xf32>
    %c0_9 = arith.constant 0 : index
    %c0_10 = arith.constant 0 : index
    %c0_11 = arith.constant 0 : index
    %34 = vector.load %arg5[%c0_9, %c0_10, %c0_11] : memref<1x3x256xf32, #tpu.memory_space<vmem>>, vector<1x3x256xf32>
    %35 = vector.shape_cast %34 : vector<1x3x256xf32> to vector<3x256xf32>
    %36 = vector.shape_cast %33 : vector<3x256xf32> to vector<1x3x256xf32>
    tpu.vector_store %arg5[%c0_9, %c0_10, %c0_11], %36 {strides = array<i32>} : memref<1x3x256xf32, #tpu.memory_space<vmem>>, vector<1x3x256xf32>,
    return
  }
  func.func @transform_0(%arg0: i32, %arg1: i32) -> (i32, i32, i32) {
    %c0_i32 = arith.constant 0 : i32
    %c0_i32_0 = arith.constant 0 : i32
    return %arg0, %c0_i32, %arg1 : i32, i32, i32
  }
  func.func @transform_1(%arg0: i32, %arg1: i32) -> (i32, i32) {
    %c0_i32 = arith.constant 0 : i32
    %c0_i32_0 = arith.constant 0 : i32
    %c0_i32_1 = arith.constant 0 : i32
    return %c0_i32, %c0_i32_0 : i32, i32
  }
  func.func @transform_2(%arg0: i32, %arg1: i32) -> (i32, i32) {
    %c0_i32 = arith.constant 0 : i32
    %c0_i32_0 = arith.constant 0 : i32
    %c0_i32_1 = arith.constant 0 : i32
    return %c0_i32, %c0_i32_0 : i32, i32
  }
  func.func @transform_3(%arg0: i32, %arg1: i32) -> (i32, i32, i32) {
    %c0_i32 = arith.constant 0 : i32
    %c0_i32_0 = arith.constant 0 : i32
    return %arg0, %c0_i32, %arg1 : i32, i32, i32
  }
  func.func @transform_4(%arg0: i32, %arg1: i32) -> (i32, i32, i32) {
    %c0_i32 = arith.constant 0 : i32
    %c0_i32_0 = arith.constant 0 : i32
    return %arg0, %c0_i32, %arg1 : i32, i32, i32
  }
}

</mosaic_0001>

<bundles_post_ra>
// kernel: _rpn_head_single.1
= control target key start
LH: loop header
LB: loop body
LE: loop exit
PB: predicated region body
PF: predicated region fallthrough
CT: control target
= control target key end

     0   :  { %s708_s15 = smov 0   ;;  %s710_s16 = smov 0   ;;  %s784_s0 = inlined_call_operand.vmem [shape: f32[2,4,256], index: 0, kind: input, shape index: {}]   ;;  %s785_s1 = inlined_call_operand.vmem [shape: f32[24,4], index: 1, kind: input, shape index: {}]   ;;  %s786_s2 = inlined_call_operand.vmem [shape: f32[24,1], index: 2, kind: input, shape index: {}]   ;;  %s787_s3 = inlined_call_operand.vmem [shape: f32[2,3,256], index: 3, kind: output, shape index: {0}]   ;;  %s788_s4 = inlined_call_operand.vmem [shape: f32[2,12,256], index: 4, kind: output, shape index: {1}]  }
   0x1   :  { %s712_s17 = smov 0  }
   0x2 LB: > { %s27_s18 = sadd.s32 1, %s673_s16  ;;  %p605_p0 = scmp.ge.s32.totalorder %s677_s17, 1  ;;  %s677_s17 = sphi %s712_s17, %s15_s17   ;;  %s673_s16 = sphi %s710_s16, %s790_s16   ;;  %s669_s15 = sphi %s708_s15, %s789_s15  }
   0x3   : > { %p29_p1 = scmp.ge.s32.totalorder %s27_s18, 2  ;;  %p188_p2 = scmp.lt.s32.totalorder %s677_s17, 3 }
   0x5   : > { %s792_s18 = smov (%p29_p1, %s27_s18), 0  ;;  %p189_p3 = pnand %p605_p0, %p188_p2 }
   0x6   : > { %v264_v0 = vld [vmem:[%s785_s1 + $0x10] sm:$0xff] (!%p189_p3)  ;;  %v262_v1 = vld [vmem:[%s785_s1] sm:$0xff] (!%p189_p3)  ;;  %v679_v2 = vmov (!%p189_p3), 0   ;;  %v263_v3 = vld [vmem:[%s785_s1 + $0x8] sm:$0xff] (!%p189_p3)  ;;  %v680_v4 = vmov (!%p189_p3), 1   ;;  %v681_v5 = vmov (!%p189_p3), 2   ;;  %v281_v10 = vlaneseq (!%p189_p3) }
   0x7   : > { %192 = sbr.rel (%p189_p3) target bundleno = 175 (0xaf), region = 32  ;;  %647 = vset.pattern.permute.xlu1 (!%p189_p3), %v679_v2  ;;  %645 = vset.pattern.permute.xlu0 (!%p189_p3), %v679_v2  ;;  %v682_v6 = vmov (!%p189_p3), 3   ;;  %v431_v7 = vld [vmem:[%s786_s2] sm:$0xff] (!%p189_p3)  ;;  %v433_v8 = vld [vmem:[%s786_s2 + $0x10] sm:$0xff] (!%p189_p3)  ;;  %v432_v9 = vld [vmem:[%s786_s2 + $0x8] sm:$0xff] (!%p189_p3)  ;;  %p232_p4 = scmp.lt.s32.totalorder (!%p189_p3), %s669_s15, 1 }
   0x8   : > { %277 = vperm.xlu0 (!%p189_p3), %645, %v264_v0   ;;  %267 = vperm.xlu1 (!%p189_p3), %647, %v262_v1   ;;  %v282_v11 = vshrl.u32 (!%p189_p3), %v281_v10, 7 }
   0xa   : > { %v319_v14 = vsub.s32 (!%p189_p3), 1, %v282_v11  ;;  %v323_v15 = vsub.s32 (!%p189_p3), 5, %v282_v11  ;;  %v283_v16 = vsub.s32 (!%p189_p3), 0, %v282_v11  ;;  %v287_v17 = vsub.s32 (!%p189_p3), 4, %v282_v11 }
   0xb   : > { %v361_v19 = vsub.s32 (!%p189_p3), 2, %v282_v11  ;;  %v365_v20 = vsub.s32 (!%p189_p3), 6, %v282_v11  ;;  %v403_v25 = vsub.s32 (!%p189_p3), 3, %v282_v11  ;;  %v407_v26 = vsub.s32 (!%p189_p3), 7, %v282_v11 }
   0xc   : > { %646 = vset.pattern.permute.xlu0 (!%p189_p3), %v680_v4  ;;  %272 = vperm.xlu1 (!%p189_p3), %647, %v263_v3  }
   0xd   : > { %314 = vperm.xlu0 (!%p189_p3), %646, %v264_v0  }
   0xe   : > { %s794_s15 = smov (!%p232_p4, %s669_s15), 1 }
   0xf   : > { %s614_s5 = sshll.u32 %s794_s15, 3  ;;  %s616_s9 = sshll.u32 %s794_s15, 5 }
  0x10   : > { %648 = vset.pattern.permute.xlu1 %v680_v4  ;;  %s239_s8 = scalar_lea.vmem %s784_s0, %s614_s5  ;;  %s762_s12 = scalar_lea.vmem %s788_s4, %s616_s9 }
  0x11   : > { %310 = vperm.xlu0 %646, %v263_v3   ;;  %306 = vperm.xlu1 %648, %v262_v1   ;;  %v261_v21 = vld [vmem:[%s239_s8] sm:$0xff]  ;;  %s249_s19 = scalar_lea.vmem %s787_s3, %s614_s5 }
  0x12   : > { %v320_v23 = vrot.slane %v261_v21, %v319_v14  ;;  %v324_v24 = vrot.slane %v261_v21, %v323_v15  ;;  %v284_v27 = vrot.slane %v261_v21, %v283_v16  ;;  %v288_v28 = vrot.slane %v261_v21, %v287_v17 }
  0x13   : > { %v362_v29 = vrot.slane %v261_v21, %v361_v19  ;;  %v366_v30 = vrot.slane %v261_v21, %v365_v20  ;;  %v404_v35 = vrot.slane %v261_v21, %v403_v25  ;;  %v408_v36 = vrot.slane %v261_v21, %v407_v26 }
  0x14   : > { %v330_v33 = vrot.slane %v320_v23, %v319_v14  ;;  %v334_v34 = vrot.slane %v324_v24, %v319_v14  ;;  %v294_v37 = vrot.slane %v284_v27, %v283_v16  ;;  %v298_v38 = vrot.slane %v288_v28, %v283_v16 }
  0x15   : > { %650 = vset.pattern.permute.xlu0 %v681_v5  ;;  %649 = vset.pattern.permute.xlu1 %v681_v5  ;;  %v372_v39 = vrot.slane %v362_v29, %v361_v19  ;;  %v376_v40 = vrot.slane %v366_v30, %v361_v19  ;;  %v414_v45 = vrot.slane %v404_v35, %v403_v25 }
  0x16   : > { %348 = vperm.xlu0 %650, %v262_v1   ;;  %356 = vperm.xlu1 %649, %v264_v0   ;;  %v418_v46 = vrot.slane %v408_v36, %v403_v25 }
  0x1a   : > { %652 = vset.pattern.permute.xlu0 %v682_v6  ;;  %352 = vperm.xlu1 %649, %v263_v3  }
  0x1b   : > { %390 = vperm.xlu0 %652, %v262_v1  }
  0x1e   : > { %651 = vset.pattern.permute.xlu1 %v682_v6 }
  0x1f   : > { %654 = vset.pattern.permute.xlu0 %v679_v2  ;;  %398 = vperm.xlu1 %651, %v264_v0  }
  0x20   : > { %436 = vperm.xlu0 %654, %v431_v7  }
  0x23   : > { %394 = vperm.xlu1 %651, %v263_v3  }
  0x27   : > { %653 = vset.pattern.permute.xlu1 %v679_v2 }
  0x28   : > { %446 = vperm.xlu1 %653, %v433_v8  }
  0x2c   : > { %441 = vperm.xlu1 %653, %v432_v9  }
  0x87   : > { %v268_v12 = vpop.permute.xlu1 %267  ;;  %v278_v13 = vpop.permute.xlu0 %277 }
  0x88   : > { %v299_v47 = vmul.f32 %v294_v37, %v268_v12  ;;  %v300_v48 = vmul.f32 %v298_v38, %v268_v12  ;;  %v303_v54 = vmul.f32 %v294_v37, %v278_v13  ;;  %v304_v55 = vmul.f32 %v298_v38, %v278_v13 }
  0x8b   : > { %v756_v18 = vpop.permute.xlu1 %272 }
  0x8c   : > { %v315_v22 = vpop.permute.xlu0 %314  ;;  %v301_v14 = vmul.f32 %v294_v37, %v756_v18  ;;  %v302_v15 = vmul.f32 %v298_v38, %v756_v18 }
  0x8d   : > { %v339_v56 = vmul.f32 %v330_v33, %v315_v22  ;;  %v340_v57 = vmul.f32 %v334_v34, %v315_v22 }
  0x8f   : > { %v345_v2 = vadd.f32 %v339_v56, %v303_v54  ;;  %v346_v3 = vadd.f32 %v340_v57, %v304_v55 }
  0x90   : > { %v311_v31 = vpop.permute.xlu0 %310  ;;  %v307_v32 = vpop.permute.xlu1 %306 }
  0x91   : > { %v335_v41 = vmul.f32 %v330_v33, %v307_v32  ;;  %v336_v42 = vmul.f32 %v334_v34, %v307_v32  ;;  %v337_v9 = vmul.f32 %v330_v33, %v311_v31  ;;  %v338_v10 = vmul.f32 %v334_v34, %v311_v31 }
  0x93   : > { %v341_v51 = vadd.f32 %v335_v41, %v299_v47  ;;  %v342_v52 = vadd.f32 %v336_v42, %v300_v48  ;;  %v343_v21 = vadd.f32 %v337_v9, %v301_v14  ;;  %v344_v22 = vadd.f32 %v338_v10, %v302_v15 }
  0x95   : > { %v349_v43 = vpop.permute.xlu0 %348  ;;  %v357_v44 = vpop.permute.xlu1 %356 }
  0x96   : > { %v377_v49 = vmul.f32 %v372_v39, %v349_v43  ;;  %v378_v50 = vmul.f32 %v376_v40, %v349_v43  ;;  %v381_v5 = vmul.f32 %v372_v39, %v357_v44  ;;  %v382_v6 = vmul.f32 %v376_v40, %v357_v44 }
  0x98   : > { %v383_v59 = vadd.f32 %v377_v49, %v341_v51  ;;  %v384_v60 = vadd.f32 %v378_v50, %v342_v52  ;;  %v387_v16 = vadd.f32 %v381_v5, %v345_v2  ;;  %v388_v17 = vadd.f32 %v382_v6, %v346_v3 }
  0x99   : > { %v353_v53 = vpop.permute.xlu1 %352 }
  0x9a   : > { %v391_v58 = vpop.permute.xlu0 %390  ;;  %v379_v19 = vmul.f32 %v372_v39, %v353_v53  ;;  %v380_v20 = vmul.f32 %v376_v40, %v353_v53 }
  0x9b   : > { %v419_v61 = vmul.f32 %v414_v45, %v391_v58  ;;  %v420_v62 = vmul.f32 %v418_v46, %v391_v58 }
  0x9c   : > { %v385_v28 = vadd.f32 %v379_v19, %v343_v21  ;;  %v386_v29 = vadd.f32 %v380_v20, %v344_v22 }
  0x9d   : > { %v425_v63 = vadd.f32 %v419_v61, %v383_v59  ;;  %v426_v0 = vadd.f32 %v420_v62, %v384_v60 }
  0x9e   : > { %v399_v1 = vpop.permute.xlu1 %398 }
  0x9f   : > { %v437_v4 = vpop.permute.xlu0 %436  ;;  %v423_v11 = vmul.f32 %v414_v45, %v399_v1  ;;  %v424_v12 = vmul.f32 %v418_v46, %v399_v1 }
  0xa0   : > { %v449_v7 = vadd.f32 %v437_v4, %v425_v63  ;;  %v450_v8 = vadd.f32 %v437_v4, %v426_v0 }
  0xa1   : > { %v429_v25 = vadd.f32 %v423_v11, %v387_v16  ;;  %v430_v26 = vadd.f32 %v424_v12, %v388_v17 }
  0xa2   : > { %455 = vst [vmem:[%s762_s12] sm:$0xff] %v449_v7  ;;  %456 = vst [vmem:[%s762_s12 + $0x8] sm:$0xff] %v450_v8  ;;  %v395_v13 = vpop.permute.xlu1 %394 }
  0xa3   : > { %v421_v23 = vmul.f32 %v414_v45, %v395_v13  ;;  %v422_v24 = vmul.f32 %v418_v46, %v395_v13 }
  0xa5   : > { %v427_v32 = vadd.f32 %v421_v23, %v385_v28  ;;  %v428_v33 = vadd.f32 %v422_v24, %v386_v29 }
  0xa7   : > { %v447_v27 = vpop.permute.xlu1 %446 }
  0xa8   : > { %v453_v30 = vadd.f32 %v447_v27, %v429_v25  ;;  %v454_v31 = vadd.f32 %v447_v27, %v430_v26 }
  0xaa   : > { %v461_v18 = vcombine.low %v453_v30, %v454_v31 }
  0xab   : > { %v442_v34 = vpop.permute.xlu1 %441 }
  0xac   : > { %463 = vst [vmem:[%s249_s19] sm:$0x77] %v461_v18  ;;  %v451_v35 = vadd.f32 %v442_v34, %v427_v32  ;;  %v452_v36 = vadd.f32 %v442_v34, %v428_v33 }
  0xae   : > { %457 = vst [vmem:[%s762_s12 + $0x10] sm:$0xf] %v451_v35  ;;  %458 = vst [vmem:[%s762_s12 + $0x18] sm:$0xf] %v452_v36 }
  0xaf PF: > { %s15_s17 = sadd.s32 1, %s677_s17   ;;  %s789_s15 = smov %s673_s16 }
  0xb0   : > { %p12_p5 = scmp.ge.s32.totalorder %s15_s17, 4   ;;  %s790_s16 = smov %s792_s18 }
  0xb2   :  { %14 = sbr.rel (!%p12_p5) target bundleno = 2 (0x2), region = 74 }

</bundles_post_ra>
